<compile_context>
chip_gen: v6e
topology: v6e:2x2x1
jax: 0.10.0
libtpu: 0.0.40
codegen_flags: <defaults>
</compile_context>

<pallas_src>
import functools

import jax
import jax.numpy as jnp
import numpy as np
from jax.experimental import pallas as pl
from jax.experimental.pallas import tpu as pltpu


def _round_up(a, b):
    return (a + b - 1) // b * b


def _pick_groups_per_step(n_groups, group_size, max_tk=2048):
    """Quantization groups handled per k grid step (tk = gps * group_size)."""
    best = None
    for g in range(1, n_groups + 1):
        if n_groups % g:
            continue
        tk = g * group_size
        if tk > max_tk:
            break
        if tk % 128 == 0:
            best = g
    if best is None:
        # Whole reduction dim in one step: tk == K equals the full array dim,
        # which is always a legal block shape.
        best = n_groups
    return best


def _int8_linear_kernel(x_ref, w_ref, sc_ref, zp_ref, b_ref, o_ref, acc_ref,
                        *, gps, gsize):
    """One (tm, tn) output tile; one k-step covering `gps` quantization groups.

    x_ref  : (tm, gps*gsize) bf16   activations
    w_ref  : (gps*gsize, tn) int8   weight, pre-transposed to (K, N)
    sc_ref : (1, gps, tn)    f32    per-group scales
    zp_ref : (1, gps, tn)    f32    per-group zero points
    b_ref  : (1, tn)         f32    bias
    o_ref  : (tm, tn)        activation dtype, written once at the last k-step
    acc_ref: (tm, tn)        f32 VMEM scratch accumulator (resident across k)
    """
    k = pl.program_id(2)

    @pl.when(k == 0)
    def _():
        acc_ref[...] = jnp.broadcast_to(b_ref[...], acc_ref.shape)

    x = x_ref[...]                                    # (tm, tk) bf16
    # Single int8 -> bf16 cast for the whole tile (exact for |code| <= 127).
    w = w_ref[...].astype(jnp.bfloat16)               # (tk, tn) bf16

    acc = jnp.zeros(acc_ref.shape, jnp.float32)
    rowsums = []
    # gps is a Python int -> static unroll over the groups in this k-step.
    for g in range(gps):
        lo = g * gsize
        x_g = x[:, lo:lo + gsize]                     # (tm, G) bf16
        # bf16 MXU dot with f32 accumulation: sum_k x[m,k] * code[k,n]
        dot_i = jnp.dot(x_g, w[lo:lo + gsize, :],
                        preferred_element_type=jnp.float32)      # (tm, tn)
        acc = acc + dot_i * sc_ref[0, g:g + 1, :]                 # f32 scale
        # Row sums of x over this group (lane reduce -> XLU) for the zero term.
        rowsums.append(jnp.sum(x_g.astype(jnp.float32), axis=1, keepdims=True))

    # Zero-point contribution as one small MXU matmul:
    #   sum_g zero[g, n] * sum_{k in g} x[m, k]  ==  rowsums @ zeros
    rs = jnp.concatenate(rowsums, axis=1)             # (tm, gps) f32
    acc = acc + jnp.dot(rs, zp_ref[0], preferred_element_type=jnp.float32)

    acc_ref[...] += acc

    @pl.when(k == pl.num_programs(2) - 1)
    def _():
        o_ref[...] = acc_ref[...].astype(o_ref.dtype)


@functools.partial(jax.jit,
                   static_argnames=("out_features", "group_size", "gps"))
def _int8_linear_fwd(x, w_kn, scales, zeros, bias, *, out_features,
                     group_size, gps):
    """Forward pass on pre-packed parameters. Only x-side work happens here."""
    orig_shape = x.shape
    K, N_pad = w_kn.shape
    n_ksteps = scales.shape[0]
    tk = gps * group_size

    x2 = x.reshape(-1, K)
    M = x2.shape[0]
    # bf16 activations: MXU fast path, halves activation HBM traffic.
    xb = x2.astype(jnp.bfloat16)

    # ---- tiling (M/N only; the K tiling was fixed at pack time) ----
    if N_pad <= 512:
        tn = N_pad
    elif N_pad % 512 == 0:
        tn = 512
    else:
        tn = 256                       # N_pad is a multiple of 256 by packing

    # bf16 packs 16 rows per sublane group: pad M to a multiple of 16.
    M_pad = _round_up(max(M, 1), 16)
    if M_pad > 256:
        tm = 256
        M_pad = _round_up(M_pad, tm)
    else:
        tm = M_pad

    # v7x has two TensorCores: if the (M, N) tile grid collapses to one tile,
    # split N (or M) in two when the halves still satisfy the (8,128) rules.
    if (M_pad // tm) * (N_pad // tn) == 1:
        if tn >= 256 and (tn // 2) % 128 == 0:
            tn //= 2
        elif tm >= 32:
            tm //= 2

    if M_pad != M:
        xb = jnp.pad(xb, ((0, M_pad - M), (0, 0)))

    grid = (M_pad // tm, N_pad // tn, n_ksteps)

    # Weight stream: 3-deep buffering once there are enough weight blocks to
    # keep the extra buffer busy (hides DMA gaps on thin decode compute).
    if grid[1] * grid[2] >= 3:
        w_spec = pl.BlockSpec((tk, tn), lambda i, j, k: (k, j),
                              pipeline_mode=pl.Buffered(3))
        n_wbuf = 3
    else:
        w_spec = pl.BlockSpec((tk, tn), lambda i, j, k: (k, j))
        n_wbuf = 2

    out_dtype = x.dtype
    # VMEM budget from the actual footprint (buffered streams + scratch), with
    # headroom, capped at 48 MiB so it also fits v7x's 64 MiB VMEM.
    footprint = (2 * tm * tk * 2                                  # x (bf16)
                 + n_wbuf * tk * tn                               # w (int8)
                 + 2 * 2 * gps * tn * 4                           # scales+zeros
                 + 2 * tn * 4                                     # bias
                 + 2 * tm * tn * jnp.dtype(out_dtype).itemsize    # out blocks
                 + tm * tn * 4)                                   # f32 acc
    vmem_limit = min(max(int(footprint * 2), 32 * 1024 * 1024),
                     48 * 1024 * 1024)

    kernel = functools.partial(_int8_linear_kernel, gps=gps, gsize=group_size)
    out = pl.pallas_call(
        kernel,
        out_shape=jax.ShapeDtypeStruct((M_pad, N_pad), out_dtype),
        grid_spec=pltpu.PrefetchScalarGridSpec(
            num_scalar_prefetch=0,
            grid=grid,
            in_specs=[
                pl.BlockSpec((tm, tk), lambda i, j, k: (i, k)),          # x
                w_spec,                                                   # w
                pl.BlockSpec((1, gps, tn), lambda i, j, k: (k, 0, j)),   # scales
                pl.BlockSpec((1, gps, tn), lambda i, j, k: (k, 0, j)),   # zeros
                pl.BlockSpec((1, tn), lambda i, j, k: (0, j)),           # bias
            ],
            out_specs=pl.BlockSpec((tm, tn), lambda i, j, k: (i, j)),
            scratch_shapes=[pltpu.VMEM((tm, tn), jnp.float32)],
        ),
        compiler_params=pltpu.CompilerParams(
            dimension_semantics=("parallel", "parallel", "arbitrary"),
            vmem_limit_bytes=vmem_limit,
        ),
    )(xb, w_kn, scales, zeros, bias)

    out = out[:M, :out_features]
    return out.reshape(*orig_shape[:-1], out_features)


class PackedInt8Linear:
    """One-time (weight-load-time) packing of Int8Linear parameters for TPU."""

    def __init__(self, weight, scales_and_zeros, bias, *, group_size=128):
        N, K = weight.shape
        if K % group_size:
            raise ValueError("in_features must be a multiple of group_size")
        n_groups = K // group_size

        # int8 code range check (astype(int8) would otherwise silently wrap).
        w_min, w_max = int(jnp.min(weight)), int(jnp.max(weight))
        if w_min < -128 or w_max > 127:
            raise ValueError(f"weight codes out of int8 range [{w_min},{w_max}]")

        # Lane/N padding, chosen so v6e/v7x tiles can be >= 256 wide.
        N_pad = _round_up(N, 128)
        if N_pad > 512 and N_pad % 256:
            N_pad = _round_up(N, 256)

        gps = _pick_groups_per_step(n_groups, group_size)
        n_ksteps = n_groups // gps

        # int8 weights (4x smaller than the module's int32 storage), transposed
        # to (K, N_pad) so the kernel contraction is a plain (tm,tk)@(tk,tn).
        w_kn = weight.astype(jnp.int8).T                          # (K, N)
        scales = scales_and_zeros[..., 0].astype(jnp.float32)     # (K//G, N)
        zeros = scales_and_zeros[..., 1].astype(jnp.float32)      # (K//G, N)
        if bias is None:
            bias = jnp.zeros((N,), jnp.float32)
        b2 = bias.astype(jnp.float32).reshape(1, N)

        if N_pad != N:
            w_kn = jnp.pad(w_kn, ((0, 0), (0, N_pad - N)))
            scales = jnp.pad(scales, ((0, 0), (0, N_pad - N)))
            zeros = jnp.pad(zeros, ((0, 0), (0, N_pad - N)))
            b2 = jnp.pad(b2, ((0, 0), (0, N_pad - N)))

        # (K//tk, gps, N_pad): one k-step's scales/zeros per leading index, so
        # each block's trailing dims (gps, tn) satisfy the tiling rules.
        scales = scales.reshape(n_ksteps, gps, N_pad)
        zeros = zeros.reshape(n_ksteps, gps, N_pad)

        self.w_kn = jax.device_put(w_kn)
        self.scales = jax.device_put(scales)
        self.zeros = jax.device_put(zeros)
        self.bias = jax.device_put(b2)
        self.out_features = N
        self.in_features = K
        self.group_size = group_size
        self.gps = gps

    def __call__(self, x):
        return _int8_linear_fwd(
            x, self.w_kn, self.scales, self.zeros, self.bias,
            out_features=self.out_features, group_size=self.group_size,
            gps=self.gps)


def _reference(x, weight, scales_and_zeros, bias, group_size):
    """Reference dequant + matmul. Mirrors the kernel's bf16 activation cast
    (weights/scales/zeros stay in f32, as in the kernel)."""
    N, K = weight.shape
    scales = scales_and_zeros[..., 0].astype(jnp.float32)               # (K//G, N)
    zeros = scales_and_zeros[..., 1].astype(jnp.float32)
    g = jnp.arange(K) // group_size
    w_dq = weight.astype(jnp.float32) * scales[g, :].T + zeros[g, :].T  # (N, K)
    xb = x.reshape(-1, K).astype(jnp.bfloat16).astype(jnp.float32)
    y = jnp.dot(xb, w_dq.T, precision=jax.lax.Precision.HIGHEST)
    if bias is not None:
        y = y + bias.astype(jnp.float32)
    return y.reshape(*x.shape[:-1], N)


if __name__ == "__main__":
    key = jax.random.PRNGKey(0)

    def make_case(k, lead_shape, in_features, out_features, group_size):
        kx, kw, ks, kb = jax.random.split(k, 4)
        x = jax.random.normal(kx, (*lead_shape, in_features), dtype=jnp.float32)
        weight = jax.random.randint(kw, (out_features, in_features), -128, 128,
                                    dtype=jnp.int32)               # int8-range codes
        saz = jax.random.normal(
            ks, (in_features // group_size, out_features, 2), dtype=jnp.float32)
        # Keep scales positive-ish like a real quantizer; zeros stay as-is.
        saz = saz.at[..., 0].set(jnp.abs(saz[..., 0]) * 0.02 + 0.005)
        bias = jax.random.normal(kb, (out_features,), dtype=jnp.float32)
        return x, weight, saz, bias

    cases = [
        # (leading shape, in_features, out_features, group_size)
        ((2, 4), 256, 128, 128),    # module defaults, decode-sized M
        ((3, 5), 384, 320, 128),    # exercises N padding and gps > 2
    ]
    for case, kk in zip(cases, jax.random.split(key, len(cases))):
        lead, K, N, G = case
        x, weight, saz, bias = make_case(kk, lead, K, N, G)
        layer = PackedInt8Linear(weight, saz, bias, group_size=G)   # one-time pack
        y = jax.block_until_ready(layer(x))
        y_ref = _reference(x, weight, saz, bias, G)
        np.testing.assert_allclose(np.asarray(y), np.asarray(y_ref),
                                   rtol=1e-3, atol=1e-3)
    print("KERNEL_OK")
</pallas_src>

<mosaic_0001>
module attributes {stable_mosaic.version = 11 : i64} {
  func.func @_int8_linear_kernel(%arg0: i32, %arg1: i32, %arg2: i32, %arg3: memref<16x256xbf16, #tpu.memory_space<vmem>>, %arg4: memref<256x128xi8, #tpu.memory_space<vmem>>, %arg5: memref<1x2x128xf32, #tpu.memory_space<vmem>>, %arg6: memref<1x2x128xf32, #tpu.memory_space<vmem>>, %arg7: memref<1x128xf32, #tpu.memory_space<vmem>>, %arg8: memref<16x128xf32, #tpu.memory_space<vmem>>, %arg9: memref<16x128xf32, #tpu.memory_space<vmem>>) attributes {dimension_semantics = [#tpu.dimension_semantics<parallel>, #tpu.dimension_semantics<parallel>, #tpu.dimension_semantics<arbitrary>], iteration_bounds = array<i64: 1, 1, 1>, scalar_prefetch = 0 : i64, scratch_operands = 1 : i64, tpu.core_type = #tpu.core_type<tc>, window_params = [{transform_indices = @transform_0, window_bounds = array<i64: 16, 256>}, {transform_indices = @transform_1, window_bounds = array<i64: 256, 128>}, {transform_indices = @transform_2, window_bounds = array<i64: 1, 2, 128>}, {transform_indices = @transform_3, window_bounds = array<i64: 1, 2, 128>}, {transform_indices = @transform_4, window_bounds = array<i64: 1, 128>}, {transform_indices = @transform_5, window_bounds = array<i64: 16, 128>}]} {
    %c0_i32 = arith.constant 0 : i32
    %0 = arith.cmpi eq, %arg2, %c0_i32 : i32
    %1 = arith.extui %0 : i1 to i32
    %c0_i32_0 = arith.constant 0 : i32
    %2 = arith.cmpi ne, %1, %c0_i32_0 : i32
    scf.if %2 {
      %c0_23 = arith.constant 0 : index
      %c0_24 = arith.constant 0 : index
      %40 = vector.load %arg7[%c0_23, %c0_24] : memref<1x128xf32, #tpu.memory_space<vmem>>, vector<1x128xf32>
      %41 = vector.shape_cast %40 : vector<1x128xf32> to vector<1x128xf32>
      %42 = vector.broadcast %41 : vector<1x128xf32> to vector<16x128xf32>
      %c0_25 = arith.constant 0 : index
      %c0_26 = arith.constant 0 : index
      %43 = vector.load %arg9[%c0_25, %c0_26] : memref<16x128xf32, #tpu.memory_space<vmem>>, vector<16x128xf32>
      tpu.vector_store %arg9[%c0_25, %c0_26], %42 {strides = array<i32>} : memref<16x128xf32, #tpu.memory_space<vmem>>, vector<16x128xf32>,
    } else {
    }
    %c0 = arith.constant 0 : index
    %c0_1 = arith.constant 0 : index
    %3 = vector.load %arg3[%c0, %c0_1] : memref<16x256xbf16, #tpu.memory_space<vmem>>, vector<16x256xbf16>
    %c0_2 = arith.constant 0 : index
    %c0_3 = arith.constant 0 : index
    %4 = vector.load %arg4[%c0_2, %c0_3] : memref<256x128xi8, #tpu.memory_space<vmem>>, vector<256x128xi8>
    %5 = arith.sitofp %4 : vector<256x128xi8> to vector<256x128xbf16>
    %cst = arith.constant 0.000000e+00 : f32
    %6 = vector.broadcast %cst : f32 to vector<16x128xf32>
    %7 = vector.extract_strided_slice %3 {offsets = [0, 0], sizes = [16, 128], strides = [1, 1]} : vector<16x256xbf16> to vector<16x128xbf16>
    %8 = vector.extract_strided_slice %5 {offsets = [0, 0], sizes = [128, 128], strides = [1, 1]} : vector<256x128xbf16> to vector<128x128xbf16>
    %cst_4 = arith.constant dense<0.000000e+00> : vector<16x128xf32>
    %9 = tpu.matmul %7, %8, %cst_4 {dimension_numbers = #tpu.dot_dimension_numbers<[1], [0], [0], [1], [0, 0, 1, 1], [], []>} : vector<16x128xbf16>, vector<128x128xbf16>, vector<16x128xf32> -> vector<16x128xf32>
    %c0_5 = arith.constant 0 : index
    %c0_6 = arith.constant 0 : index
    %c0_7 = arith.constant 0 : index
    %10 = vector.load %arg5[%c0_5, %c0_6, %c0_7] : memref<1x2x128xf32, #tpu.memory_space<vmem>>, vector<1x1x128xf32>
    %11 = vector.shape_cast %10 : vector<1x1x128xf32> to vector<1x128xf32>
    %12 = vector.broadcast %11 : vector<1x128xf32> to vector<16x128xf32>
    %13 = arith.mulf %9, %12 : vector<16x128xf32>
    %14 = arith.addf %6, %13 : vector<16x128xf32>
    %15 = arith.extf %7 : vector<16x128xbf16> to vector<16x128xf32>
    %cst_8 = arith.constant dense<0.000000e+00> : vector<16xf32>
    %16 = vector.multi_reduction <add>, %15, %cst_8 [1] : vector<16x128xf32> to vector<16xf32>
    %17 = vector.shape_cast %16 : vector<16xf32> to vector<16x1xf32>
    %18 = vector.extract_strided_slice %3 {offsets = [0, 128], sizes = [16, 128], strides = [1, 1]} : vector<16x256xbf16> to vector<16x128xbf16>
    %19 = vector.extract_strided_slice %5 {offsets = [128, 0], sizes = [128, 128], strides = [1, 1]} : vector<256x128xbf16> to vector<128x128xbf16>
    %cst_9 = arith.constant dense<0.000000e+00> : vector<16x128xf32>
    %20 = tpu.matmul %18, %19, %cst_9 {dimension_numbers = #tpu.dot_dimension_numbers<[1], [0], [0], [1], [0, 0, 1, 1], [], []>} : vector<16x128xbf16>, vector<128x128xbf16>, vector<16x128xf32> -> vector<16x128xf32>
    %c0_10 = arith.constant 0 : index
    %c1 = arith.constant 1 : index
    %c0_11 = arith.constant 0 : index
    %21 = vector.load %arg5[%c0_10, %c1, %c0_11] : memref<1x2x128xf32, #tpu.memory_space<vmem>>, vector<1x1x128xf32>
    %22 = vector.shape_cast %21 : vector<1x1x128xf32> to vector<1x128xf32>
    %23 = vector.broadcast %22 : vector<1x128xf32> to vector<16x128xf32>
    %24 = arith.mulf %20, %23 : vector<16x128xf32>
    %25 = arith.addf %14, %24 : vector<16x128xf32>
    %26 = arith.extf %18 : vector<16x128xbf16> to vector<16x128xf32>
    %cst_12 = arith.constant dense<0.000000e+00> : vector<16xf32>
    %27 = vector.multi_reduction <add>, %26, %cst_12 [1] : vector<16x128xf32> to vector<16xf32>
    %28 = vector.shape_cast %27 : vector<16xf32> to vector<16x1xf32>
    %29 = tpu.concatenate %17, %28 in 1 : vector<16x1xf32>, vector<16x1xf32> -> vector<16x2xf32>
    %c0_13 = arith.constant 0 : index
    %c0_14 = arith.constant 0 : index
    %c0_15 = arith.constant 0 : index
    %30 = vector.load %arg6[%c0_13, %c0_14, %c0_15] : memref<1x2x128xf32, #tpu.memory_space<vmem>>, vector<1x2x128xf32>
    %31 = vector.shape_cast %30 : vector<1x2x128xf32> to vector<2x128xf32>
    %cst_16 = arith.constant dense<0.000000e+00> : vector<16x128xf32>
    %32 = tpu.matmul %29, %31, %cst_16 {dimension_numbers = #tpu.dot_dimension_numbers<[1], [0], [0], [1], [0, 0, 1, 1], [], []>} : vector<16x2xf32>, vector<2x128xf32>, vector<16x128xf32> -> vector<16x128xf32>
    %33 = arith.addf %25, %32 : vector<16x128xf32>
    %c0_17 = arith.constant 0 : index
    %c0_18 = arith.constant 0 : index
    %34 = vector.load %arg9[%c0_17, %c0_18] : memref<16x128xf32, #tpu.memory_space<vmem>>, vector<16x128xf32>
    %35 = arith.addf %34, %33 : vector<16x128xf32>
    %c0_19 = arith.constant 0 : index
    %c0_20 = arith.constant 0 : index
    %36 = vector.load %arg9[%c0_19, %c0_20] : memref<16x128xf32, #tpu.memory_space<vmem>>, vector<16x128xf32>
    tpu.vector_store %arg9[%c0_19, %c0_20], %35 {strides = array<i32>} : memref<16x128xf32, #tpu.memory_space<vmem>>, vector<16x128xf32>,
    %c0_i32_21 = arith.constant 0 : i32
    %37 = arith.cmpi eq, %arg2, %c0_i32_21 : i32
    %38 = arith.extui %37 : i1 to i32
    %c0_i32_22 = arith.constant 0 : i32
    %39 = arith.cmpi ne, %38, %c0_i32_22 : i32
    scf.if %39 {
      %c0_23 = arith.constant 0 : index
      %c0_24 = arith.constant 0 : index
      %40 = vector.load %arg9[%c0_23, %c0_24] : memref<16x128xf32, #tpu.memory_space<vmem>>, vector<16x128xf32>
      %c0_25 = arith.constant 0 : index
      %c0_26 = arith.constant 0 : index
      %41 = vector.load %arg8[%c0_25, %c0_26] : memref<16x128xf32, #tpu.memory_space<vmem>>, vector<16x128xf32>
      tpu.vector_store %arg8[%c0_25, %c0_26], %40 {strides = array<i32>} : memref<16x128xf32, #tpu.memory_space<vmem>>, vector<16x128xf32>,
    } else {
    }
    return
  }
  func.func @transform_0(%arg0: i32, %arg1: i32, %arg2: i32) -> (i32, i32) {
    %c0_i32 = arith.constant 0 : i32
    return %arg0, %arg2 : i32, i32
  }
  func.func @transform_1(%arg0: i32, %arg1: i32, %arg2: i32) -> (i32, i32) {
    %c0_i32 = arith.constant 0 : i32
    return %arg2, %arg1 : i32, i32
  }
  func.func @transform_2(%arg0: i32, %arg1: i32, %arg2: i32) -> (i32, i32, i32) {
    %c0_i32 = arith.constant 0 : i32
    %c0_i32_0 = arith.constant 0 : i32
    return %arg2, %c0_i32, %arg1 : i32, i32, i32
  }
  func.func @transform_3(%arg0: i32, %arg1: i32, %arg2: i32) -> (i32, i32, i32) {
    %c0_i32 = arith.constant 0 : i32
    %c0_i32_0 = arith.constant 0 : i32
    return %arg2, %c0_i32, %arg1 : i32, i32, i32
  }
  func.func @transform_4(%arg0: i32, %arg1: i32, %arg2: i32) -> (i32, i32) {
    %c0_i32 = arith.constant 0 : i32
    %c0_i32_0 = arith.constant 0 : i32
    return %c0_i32, %arg1 : i32, i32
  }
  func.func @transform_5(%arg0: i32, %arg1: i32, %arg2: i32) -> (i32, i32) {
    %c0_i32 = arith.constant 0 : i32
    return %arg0, %arg1 : i32, i32
  }
}

</mosaic_0001>

<bundles_post_ra>
// kernel: _int8_linear_fwd.1
= control target key start
LH: loop header
LB: loop body
LE: loop exit
PB: predicated region body
PF: predicated region fallthrough
CT: control target
= control target key end

     0   :  { %v373_v2 = vmov 0.0   ;;  %vm374_vm0 = vmmov 0   ;;  %vm197_vm1 = vcmask 1041408   ;;  %vm186_vm2 = vcmask 7168   ;;  %s483_s0 = inlined_call_operand.vmem [shape: bf16[16,256], index: 0, kind: input, shape index: {}]   ;;  %s484_s1 = inlined_call_operand.vmem [shape: s8[256,128], index: 1, kind: input, shape index: {}]   ;;  %s485_s3 = inlined_call_operand.vmem [shape: f32[1,2,128], index: 3, kind: input, shape index: {}]   ;;  %s486_s2 = inlined_call_operand.vmem [shape: f32[1,2,128], index: 2, kind: input, shape index: {}]   ;;  %s487_s4 = inlined_call_operand.vmem [shape: f32[1,128], index: 4, kind: input, shape index: {}]   ;;  %s488_s5 = inlined_call_operand.vmem [shape: f32[16,128], index: 5, kind: output, shape index: {}]  }
   0x1   :  { %v408_v0 = vld [vmem:[%s483_s0 + $0x8] sm:$0xff]  ;;  %v413_v1 = vld [vmem:[%s483_s0] sm:$0xff]  ;;  %324 = vmatprep.subr.bf16.mxu0 %v373_v2  ;;  %v39_v3 = vld [vmem:[%s484_s1 + $0x18] sm:$0xff]  ;;  %344 = vmatprep.subr.bf16.mxu1 %v373_v2  ;;  %vm190_vm3 = vcmask 15360  }
   0x2   :  { %v117_v4 = vunpack.c.l.bf16 %v408_v0  ;;  %v116_v5 = vunpack.c.l.bf16 %v413_v1  ;;  %v177_v6 = vrot.slane %v408_v0, 4  ;;  %v176_v7 = vrot.slane %v413_v1, 4  ;;  %v43_v8 = vld [vmem:[%s484_s1 + $0x38] sm:$0xff]  ;;  %340 = vmatprep.mubr.msk.bf16.mxu0 %vm374_vm0, %v373_v2  ;;  %360 = vmatprep.mubr.msk.bf16.mxu1 %vm374_vm0, %v373_v2  ;;  %v38_v15 = vld [vmem:[%s484_s1 + $0x10] sm:$0xff]  ;;  %v37_v21 = vld [vmem:[%s484_s1 + $0x8] sm:$0xff] }
   0x3   :  { %v51_v9 = vunpack.c.h.s8.bf16 %v39_v3  ;;  %v59_v10 = vunpack.c.h.s8.bf16 %v43_v8  ;;  %v50_v13 = vunpack.c.l.s8.bf16 %v39_v3  ;;  %v58_v14 = vunpack.c.l.s8.bf16 %v43_v8  ;;  %v42_v16 = vld [vmem:[%s484_s1 + $0x30] sm:$0xff]  ;;  %v41_v22 = vld [vmem:[%s484_s1 + $0x28] sm:$0xff]  ;;  %v36_v27 = vld [vmem:[%s484_s1] sm:$0xff] }
   0x4   :  { %120 = vadd.xlane.f32.xlu1 %v117_v4  ;;  %118 = vadd.xlane.f32.xlu0 %v116_v5  ;;  %v181_v11 = vunpack.c.l.bf16 %v177_v6  ;;  %v180_v12 = vunpack.c.l.bf16 %v176_v7  ;;  %v49_v17 = vunpack.c.h.s8.bf16 %v38_v15  ;;  %v57_v18 = vunpack.c.h.s8.bf16 %v42_v16  ;;  %v40_v28 = vld [vmem:[%s484_s1 + $0x20] sm:$0xff] }
   0x5   :  { %325 = vmatpush3.bf16.msra.mxu0 %v51_v9  ;;  %345 = vmatpush3.bf16.msra.mxu1 %v59_v10  ;;  %v48_v19 = vunpack.c.l.s8.bf16 %v38_v15  ;;  %v56_v20 = vunpack.c.l.s8.bf16 %v42_v16  ;;  %v47_v23 = vunpack.c.h.s8.bf16 %v37_v21  ;;  %v55_v24 = vunpack.c.h.s8.bf16 %v41_v22  ;;  %v189_v33 = vld [vmem:[%s485_s3] sm:$0x3] }
   0x6   :  { %326 = vmatprep.subr.bf16.mxu0 %v373_v2  ;;  %346 = vmatprep.subr.bf16.mxu1 %v373_v2  ;;  %v46_v25 = vunpack.c.l.s8.bf16 %v37_v21  ;;  %v54_v26 = vunpack.c.l.s8.bf16 %v41_v22  ;;  %v45_v29 = vunpack.c.h.s8.bf16 %v36_v27  ;;  %v53_v30 = vunpack.c.h.s8.bf16 %v40_v28  ;;  %v297_v42 = vld [vmem:[%s486_s2] ss:$0 sm:$0xff]  ;;  %v299_v43 = vld [vmem:[%s486_s2 + $0x1] ss:$0 sm:$0xff] }
   0x7   :  { %v44_v31 = vunpack.c.l.s8.bf16 %v36_v27  ;;  %v52_v32 = vunpack.c.l.s8.bf16 %v40_v28  ;;  %v296_v34 = vcombine.low %v413_v1, %v408_v0  ;;  %v298_v35 = vcombine.high %v413_v1, %v408_v0  ;;  %v295_v58 = vld [vmem:[%s487_s4] ss:$0 sm:$0xff] }
   0x8   :  { %184 = vadd.xlane.f32.xlu1 %v181_v11  ;;  %182 = vadd.xlane.f32.xlu0 %v180_v12 }
   0x9   :  { %327 = vmatpush3.bf16.msra.mxu0 %v50_v13  ;;  %347 = vmatpush3.bf16.msra.mxu1 %v58_v14 }
   0xa   :  { %328 = vmatprep.subr.bf16.mxu0 %v373_v2  ;;  %348 = vmatprep.subr.bf16.mxu1 %v373_v2 }
   0xd   :  { %329 = vmatpush3.bf16.msra.mxu0 %v49_v17  ;;  %349 = vmatpush3.bf16.msra.mxu1 %v57_v18 }
   0xe   :  { %330 = vmatprep.subr.bf16.mxu0 %v373_v2  ;;  %350 = vmatprep.subr.bf16.mxu1 %v373_v2 }
  0x11   :  { %331 = vmatpush3.bf16.msra.mxu0 %v48_v19  ;;  %351 = vmatpush3.bf16.msra.mxu1 %v56_v20 }
  0x12   :  { %332 = vmatprep.subr.bf16.mxu0 %v373_v2  ;;  %352 = vmatprep.subr.bf16.mxu1 %v373_v2 }
  0x15   :  { %333 = vmatpush3.bf16.msra.mxu0 %v47_v23  ;;  %353 = vmatpush3.bf16.msra.mxu1 %v55_v24 }
  0x16   :  { %334 = vmatprep.subr.bf16.mxu0 %v373_v2  ;;  %354 = vmatprep.subr.bf16.mxu1 %v373_v2 }
  0x19   :  { %335 = vmatpush3.bf16.msra.mxu0 %v46_v25  ;;  %355 = vmatpush3.bf16.msra.mxu1 %v54_v26 }
  0x1a   :  { %336 = vmatprep.subr.bf16.mxu0 %v373_v2  ;;  %356 = vmatprep.subr.bf16.mxu1 %v373_v2 }
  0x1d   :  { %337 = vmatpush3.bf16.msra.mxu0 %v45_v29  ;;  %357 = vmatpush3.bf16.msra.mxu1 %v53_v30 }
  0x1e   :  { %338 = vmatprep.subr.bf16.mxu0 %v373_v2  ;;  %358 = vmatprep.subr.bf16.mxu1 %v373_v2 }
  0x21   :  { %339 = vmatpush3.bf16.msra.mxu0 %v44_v31  ;;  %359 = vmatpush3.bf16.msra.mxu1 %v52_v32 }
  0x22   :  { %364 = vmatprep.subr.msk.mxu0 %vm197_vm1, %v189_v33 }
  0x24   :  { %341 = vmatmul.mubr.bf16.vlgmr.msra.gmra.mxu0 %v296_v34  ;;  %361 = vmatmul.mubr.bf16.vlgmr.msra.gmra.mxu1 %v298_v35 }
  0x25   :  { %365 = vmatpush3.msk.msra.mxu0 %vm197_vm1, %v189_v33 }
  0x8d   :  { %v121_v36 = vpop.xlane.xlu1 %120  ;;  %v119_v37 = vpop.xlane.xlu0 %118 }
  0x91   :  { %v185_v38 = vpop.xlane.xlu1 %184  ;;  %v183_v39 = vpop.xlane.xlu0 %182 }
  0x92   :  { %v188_v40 = vsel %vm186_vm2, %v121_v36, %v185_v38  ;;  %v187_v41 = vsel %vm186_vm2, %v119_v37, %v183_v39 }
  0x93   :  { %366 = vmatprep.mubr.msk.f32.mxu0 %vm190_vm3, %v187_v41 }
  0x94   :  { %367 = vmatmul.mubr.msk.f32.vlgmr.msra.gmra.mxu0 %vm190_vm3, %v188_v40 }
  0xe4   :  { %v100_v44 = vpop.f32.mrf.mxu0  ;;  %v160_v45 = vpop.f32.mrf.mxu1 }
  0xe5   :  { %v112_v46 = vmul.f32 %v297_v42, %v100_v44  ;;  %v172_v47 = vmul.f32 %v299_v43, %v160_v45 }
  0xe6   :  { %v342_v48 = vpop.f32.mrf.mxu0  ;;  %v362_v49 = vpop.f32.mrf.mxu1 }
  0xe7   :  { %v174_v50 = vadd.f32 %v172_v47, %v112_v46 }
  0xe8   :  { %v103_v51 = vpop.f32.mrf.mxu0  ;;  %v163_v52 = vpop.f32.mrf.mxu1 }
  0xe9   :  { %v113_v53 = vmul.f32 %v297_v42, %v103_v51  ;;  %v173_v54 = vmul.f32 %v299_v43, %v163_v52 }
  0xea   :  { %v343_v55 = vpop.f32.mrf.mxu0  ;;  %v363_v56 = vpop.f32.mrf.mxu1 }
  0xeb   :  { %v175_v57 = vadd.f32 %v173_v54, %v113_v53 }
 0x154   :  { %v368_v59 = vpop.f32.mrf.mxu0 }
 0x155   :  { %v277_v60 = vadd.f32 %v368_v59, %v175_v57 }
 0x156   :  { %v267_v61 = vpop.f32.mrf.mxu0 }
 0x157   :  { %v281_v62 = vadd.f32 %v295_v58, %v277_v60  ;;  %v276_v63 = vadd.f32 %v267_v61, %v174_v50 }
 0x159   :  { %290 = vst [vmem:[%s488_s5 + $0x8] sm:$0xff] %v281_v62  ;;  %v280_v0 = vadd.f32 %v295_v58, %v276_v63 }
 0x15b   :  { %289 = vst [vmem:[%s488_s5] sm:$0xff] %v280_v0 }

</bundles_post_ra>
